<compile_context>
chip_gen: v7x
topology: tpu7x:2x2x1
jax: 0.10.0
libtpu: 0.0.40
codegen_flags: <defaults>
</compile_context>

<pallas_src>
import functools

import jax
import jax.numpy as jnp
from jax.experimental import pallas as pl
from jax.experimental.pallas import tpu as pltpu


def _independent_dropout_kernel(keep_prob, u1_ref, u2_ref, x_ref, y_ref, ox_ref, oy_ref):
    """Per-tile body.

    u1_ref, u2_ref : VMEM (TR, 1)  float32 uniforms in [0, 1)
    x_ref,  y_ref  : VMEM (TR, Hx) / (TR, Hy) item tiles
    ox_ref, oy_ref : VMEM output tiles
    """
    keep = jnp.float32(keep_prob)

    # Bernoulli(1 - p) keep masks, one per (batch, token) row.
    m1 = (u1_ref[...] < keep).astype(jnp.float32)          # (TR, 1)
    m2 = (u2_ref[...] < keep).astype(jnp.float32)          # (TR, 1)

    # scale = n_items / max(total, 1); with 2 items total ∈ {0,1,2}
    #   total ∈ {0,1} -> 2.0,   total == 2 -> 1.0      (select, no divide)
    total = m1 + m2
    scale = jnp.where(total < jnp.float32(1.5), jnp.float32(2.0), jnp.float32(1.0))

    f1 = (m1 * scale).astype(x_ref.dtype)                  # (TR, 1) factor
    f2 = (m2 * scale).astype(y_ref.dtype)

    # Broadcast the (TR, 1) factor over the hidden dim (pure VPU work).
    ox_ref[...] = x_ref[...] * f1
    oy_ref[...] = y_ref[...] * f2


def independent_dropout(x, y, key, p=0.5, training=True, tile_rows=512):
    """Pallas implementation of IndependentDropout.forward(x, y).

    x : (B, S, Hx), y : (B, S, Hy) arrays sharing the leading two dims.
    key : jax.random PRNG key for the dropout masks.
    """
    if not training:
        return x, y

    assert x.shape[:2] == y.shape[:2], "items must share (batch, seq) dims"
    B, S, Hx = x.shape
    Hy = y.shape[2]
    R = B * S

    x2 = x.reshape(R, Hx)
    y2 = y.reshape(R, Hy)

    # Per-(batch, token) uniforms in a broadcast-ready (rows, 1) layout.
    k1, k2 = jax.random.split(key)
    u1 = jax.random.uniform(k1, (R, 1), dtype=jnp.float32)
    u2 = jax.random.uniform(k2, (R, 1), dtype=jnp.float32)

    # Tile over the token axis; each block is small enough to double-buffer
    # comfortably within the scoped VMEM budget on v5e/v6e/v7x.
    TR = tile_rows if R >= tile_rows else R
    grid = (pl.cdiv(R, TR),)

    kernel = functools.partial(_independent_dropout_kernel, 1.0 - p)

    out_x, out_y = pl.pallas_call(
        kernel,
        out_shape=(
            jax.ShapeDtypeStruct((R, Hx), x.dtype),
            jax.ShapeDtypeStruct((R, Hy), y.dtype),
        ),
        grid=grid,
        in_specs=[
            pl.BlockSpec((TR, 1), lambda i: (i, 0)),    # u1
            pl.BlockSpec((TR, 1), lambda i: (i, 0)),    # u2
            pl.BlockSpec((TR, Hx), lambda i: (i, 0)),   # x tile
            pl.BlockSpec((TR, Hy), lambda i: (i, 0)),   # y tile
        ],
        out_specs=(
            pl.BlockSpec((TR, Hx), lambda i: (i, 0)),
            pl.BlockSpec((TR, Hy), lambda i: (i, 0)),
        ),
        compiler_params=pltpu.CompilerParams(
            dimension_semantics=("parallel",),          # shard tiles across TCs on v7x
            vmem_limit_bytes=64 * 1024 * 1024,
        ),
    )(u1, u2, x2, y2)

    return out_x.reshape(B, S, Hx), out_y.reshape(B, S, Hy)


if __name__ == "__main__":
    key = jax.random.PRNGKey(0)
    kx, ky, kd = jax.random.split(key, 3)

    # Two (batch, seq, hidden) embeddings, as the module implies.
    B, S, H = 2, 8, 32
    p = 0.5
    x = jax.random.normal(kx, (B, S, H), dtype=jnp.float32)
    y = jax.random.normal(ky, (B, S, H), dtype=jnp.float32)

    out_x, out_y = independent_dropout(x, y, kd, p=p, training=True)
    out_x = jax.block_until_ready(out_x)
    out_y = jax.block_until_ready(out_y)

    # Pure-JAX reference (same RNG draw as the wrapper) for a correctness check.
    k1, k2 = jax.random.split(kd)
    u1 = jax.random.uniform(k1, (B * S, 1), dtype=jnp.float32).reshape(B, S, 1)
    u2 = jax.random.uniform(k2, (B * S, 1), dtype=jnp.float32).reshape(B, S, 1)
    m1 = (u1 < (1.0 - p)).astype(jnp.float32)
    m2 = (u2 < (1.0 - p)).astype(jnp.float32)
    total = m1 + m2
    scale = 2.0 / jnp.maximum(total, 1.0)
    ref_x = x * (m1 * scale)
    ref_y = y * (m2 * scale)

    assert out_x.shape == x.shape and out_y.shape == y.shape
    assert out_x.dtype == x.dtype and out_y.dtype == y.dtype
    assert bool(jnp.all(jnp.isfinite(out_x))) and bool(jnp.all(jnp.isfinite(out_y)))
    assert bool(jnp.allclose(out_x, ref_x, atol=1e-6))
    assert bool(jnp.allclose(out_y, ref_y, atol=1e-6))

    # Eval mode is a passthrough.
    ex, ey = independent_dropout(x, y, kd, p=p, training=False)
    assert bool(jnp.all(ex == x)) and bool(jnp.all(ey == y))

    print("KERNEL_OK")
</pallas_src>

<mosaic_0001>
module attributes {stable_mosaic.version = 11 : i64} {
  func.func @_independent_dropout_kernel(%arg0: i32, %arg1: memref<16x1xf32, #tpu.memory_space<vmem>>, %arg2: memref<16x1xf32, #tpu.memory_space<vmem>>, %arg3: memref<16x32xf32, #tpu.memory_space<vmem>>, %arg4: memref<16x32xf32, #tpu.memory_space<vmem>>, %arg5: memref<16x32xf32, #tpu.memory_space<vmem>>, %arg6: memref<16x32xf32, #tpu.memory_space<vmem>>) attributes {dimension_semantics = [#tpu.dimension_semantics<parallel>], iteration_bounds = array<i64: 1>, scalar_prefetch = 0 : i64, scratch_operands = 0 : i64, tpu.core_type = #tpu.core_type<tc>, window_params = [{transform_indices = @transform_0, window_bounds = array<i64: 16, 1>}, {transform_indices = @transform_1, window_bounds = array<i64: 16, 1>}, {transform_indices = @transform_2, window_bounds = array<i64: 16, 32>}, {transform_indices = @transform_3, window_bounds = array<i64: 16, 32>}, {transform_indices = @transform_4, window_bounds = array<i64: 16, 32>}, {transform_indices = @transform_5, window_bounds = array<i64: 16, 32>}]} {
    %c0 = arith.constant 0 : index
    %c0_0 = arith.constant 0 : index
    %0 = vector.load %arg1[%c0, %c0_0] : memref<16x1xf32, #tpu.memory_space<vmem>>, vector<16x1xf32>
    %cst = arith.constant 5.000000e-01 : f32
    %1 = vector.broadcast %cst : f32 to vector<16x1xf32>
    %2 = arith.cmpf olt, %0, %1 : vector<16x1xf32>
    %3 = arith.extui %2 : vector<16x1xi1> to vector<16x1xi32>
    %4 = arith.sitofp %3 : vector<16x1xi32> to vector<16x1xf32>
    %c0_1 = arith.constant 0 : index
    %c0_2 = arith.constant 0 : index
    %5 = vector.load %arg2[%c0_1, %c0_2] : memref<16x1xf32, #tpu.memory_space<vmem>>, vector<16x1xf32>
    %cst_3 = arith.constant 5.000000e-01 : f32
    %6 = vector.broadcast %cst_3 : f32 to vector<16x1xf32>
    %7 = arith.cmpf olt, %5, %6 : vector<16x1xf32>
    %8 = arith.extui %7 : vector<16x1xi1> to vector<16x1xi32>
    %9 = arith.sitofp %8 : vector<16x1xi32> to vector<16x1xf32>
    %10 = arith.addf %4, %9 : vector<16x1xf32>
    %cst_4 = arith.constant 1.500000e+00 : f32
    %11 = vector.broadcast %cst_4 : f32 to vector<16x1xf32>
    %12 = arith.cmpf olt, %10, %11 : vector<16x1xf32>
    %cst_5 = arith.constant 2.000000e+00 : f32
    %cst_6 = arith.constant 1.000000e+00 : f32
    %13 = vector.broadcast %cst_5 : f32 to vector<16x1xf32>
    %14 = vector.broadcast %cst_6 : f32 to vector<16x1xf32>
    %15 = arith.select %12, %13, %14 : vector<16x1xi1>, vector<16x1xf32>
    %16 = arith.mulf %4, %15 : vector<16x1xf32>
    %17 = arith.mulf %9, %15 : vector<16x1xf32>
    %c0_7 = arith.constant 0 : index
    %c0_8 = arith.constant 0 : index
    %18 = vector.load %arg3[%c0_7, %c0_8] : memref<16x32xf32, #tpu.memory_space<vmem>>, vector<16x32xf32>
    %19 = vector.broadcast %16 : vector<16x1xf32> to vector<16x32xf32>
    %20 = arith.mulf %18, %19 : vector<16x32xf32>
    %c0_9 = arith.constant 0 : index
    %c0_10 = arith.constant 0 : index
    %21 = vector.load %arg5[%c0_9, %c0_10] : memref<16x32xf32, #tpu.memory_space<vmem>>, vector<16x32xf32>
    tpu.vector_store %arg5[%c0_9, %c0_10], %20 {strides = array<i32>} : memref<16x32xf32, #tpu.memory_space<vmem>>, vector<16x32xf32>,
    %c0_11 = arith.constant 0 : index
    %c0_12 = arith.constant 0 : index
    %22 = vector.load %arg4[%c0_11, %c0_12] : memref<16x32xf32, #tpu.memory_space<vmem>>, vector<16x32xf32>
    %23 = vector.broadcast %17 : vector<16x1xf32> to vector<16x32xf32>
    %24 = arith.mulf %22, %23 : vector<16x32xf32>
    %c0_13 = arith.constant 0 : index
    %c0_14 = arith.constant 0 : index
    %25 = vector.load %arg6[%c0_13, %c0_14] : memref<16x32xf32, #tpu.memory_space<vmem>>, vector<16x32xf32>
    tpu.vector_store %arg6[%c0_13, %c0_14], %24 {strides = array<i32>} : memref<16x32xf32, #tpu.memory_space<vmem>>, vector<16x32xf32>,
    return
  }
  func.func @transform_0(%arg0: i32) -> (i32, i32) {
    %c0_i32 = arith.constant 0 : i32
    %c0_i32_0 = arith.constant 0 : i32
    return %arg0, %c0_i32 : i32, i32
  }
  func.func @transform_1(%arg0: i32) -> (i32, i32) {
    %c0_i32 = arith.constant 0 : i32
    %c0_i32_0 = arith.constant 0 : i32
    return %arg0, %c0_i32 : i32, i32
  }
  func.func @transform_2(%arg0: i32) -> (i32, i32) {
    %c0_i32 = arith.constant 0 : i32
    %c0_i32_0 = arith.constant 0 : i32
    return %arg0, %c0_i32 : i32, i32
  }
  func.func @transform_3(%arg0: i32) -> (i32, i32) {
    %c0_i32 = arith.constant 0 : i32
    %c0_i32_0 = arith.constant 0 : i32
    return %arg0, %c0_i32 : i32, i32
  }
  func.func @transform_4(%arg0: i32) -> (i32, i32) {
    %c0_i32 = arith.constant 0 : i32
    %c0_i32_0 = arith.constant 0 : i32
    return %arg0, %c0_i32 : i32, i32
  }
  func.func @transform_5(%arg0: i32) -> (i32, i32) {
    %c0_i32 = arith.constant 0 : i32
    %c0_i32_0 = arith.constant 0 : i32
    return %arg0, %c0_i32 : i32, i32
  }
}

</mosaic_0001>

<bundles_post_ra>
// kernel: tpu_custom_call.1
= control target key start
LH: loop header
LB: loop body
LE: loop exit
PB: predicated region body
PF: predicated region fallthrough
CT: control target
= control target key end

     0   :  { %11 = vsyncpa [#allocation3], 0  ;;  %s485_s0 = inlined_call_operand.hbm [shape: f32[16,1], index: 0, kind: input, shape index: {}]   ;;  %s486_s1 = inlined_call_operand.hbm [shape: f32[16,1], index: 1, kind: input, shape index: {}]   ;;  %s487_s2 = inlined_call_operand.hbm [shape: f32[16,32], index: 2, kind: input, shape index: {}]   ;;  %s488_s3 = inlined_call_operand.hbm [shape: f32[16,32], index: 3, kind: input, shape index: {}]   ;;  %s489_s4 = inlined_call_operand.hbm [shape: f32[16,32], index: 4, kind: output, shape index: {0}]   ;;  %s490_s5 = inlined_call_operand.hbm [shape: f32[16,32], index: 5, kind: output, shape index: {1}]  }
   0x1   :  { %12 = vsyncpa [#allocation6], 0 }
   0x2   :  { %13 = vsyncpa [#allocation9], 0 }
   0x3   :  { %14 = vsyncpa [#allocation4], 0 }
   0x4   :  { %15 = vsyncpa [#allocation12], 0  ;;  %s329_s18 = smov [#allocation5]   ;;  %s330_s20 = smov [#allocation2]  }
   0x5   :  { %s33_s19 = sshll.u32 %s329_s18, 4  ;;  %s21_s21 = sshll.u32 %s330_s20, 4  ;;  %s34_s19 = int_to_ptr.vmem [resolvable:$true] %s33_s19  ;;  %s370_s21 = int_to_ptr.vmem [resolvable:$true] %s21_s21 }
   0x6   :  { %s187_s24 = scalar_lea.hbm %s486_s1, 256 }
   0x7   :  { %p188_p0 = scmp.ne.s32.totalorder %s486_s1, %s187_s24  ;;  %p191_p1 = scmp.lt.u32.totalorder %s187_s24, %s486_s1 }
   0x9   :  { %p193_p2 = pnand %p191_p1, %p188_p0 }
   0xb   :  { %196 = shalt.err (!%p193_p2)
}
   0xc   :  { %s197_s29 = scalar_lea.vmem %s34_s19, 256  ;;  %p202_p4 = scmp.lt.s32.totalorder %s34_s19, %s34_s19 }
   0xd   :  { %p198_p3 = scmp.ne.s32.totalorder %s34_s19, %s197_s29  ;;  %p203_p5 = scmp.lt.s32.totalorder %s197_s29, %s197_s29 }
   0xf   :  { %p204_p6 = por %p203_p5, %p202_p4 }
  0x11   :  { %p205_p7 = pnand %p204_p6, %p198_p3 }
  0x13   :  { %208 = shalt.err (!%p205_p7)
}
  0x14   :  { %s331_s30 = smov 128   ;;  %s332_s6 = smov 8  }
  0x15   :  { %39 = dma.hbm_to_vmem [thread:$0]  %s486_s1, 256, %s34_s19, [#allocation6], %s331_s30, %s331_s30, %s332_s6  }
  0x16   :  { %s209_s11 = scalar_lea.hbm %s485_s0, 256 }
  0x17   :  { %p210_p8 = scmp.ne.s32.totalorder %s485_s0, %s209_s11  ;;  %p213_p9 = scmp.lt.u32.totalorder %s209_s11, %s485_s0 }
  0x19   :  { %p215_p10 = pnand %p213_p9, %p210_p8 }
  0x1b   :  { %218 = shalt.err (!%p215_p10)
}
  0x1c   :  { %s219_s16 = scalar_lea.vmem %s370_s21, 256  ;;  %p224_p12 = scmp.lt.s32.totalorder %s370_s21, %s370_s21 }
  0x1d   :  { %p220_p11 = scmp.ne.s32.totalorder %s370_s21, %s219_s16  ;;  %p225_p13 = scmp.lt.s32.totalorder %s219_s16, %s219_s16 }
  0x1f   :  { %p226_p0 = por %p225_p13, %p224_p12 }
  0x21   :  { %p227_p1 = pnand %p226_p0, %p220_p11 }
  0x23   :  { %230 = shalt.err (!%p227_p1)
}
  0x24   :  { %27 = dma.hbm_to_vmem [thread:$0]  %s485_s0, 256, %s370_s21, [#allocation3], %s331_s30, %s331_s30, %s332_s6  }
  0x25   :  { %s333_s18 = smov [#allocation7]   ;;  %s334_s20 = smov [#allocation8]  }
  0x26   :  { %s45_s19 = sshll.u32 %s333_s18, 4  ;;  %s57_s22 = sshll.u32 %s334_s20, 4  ;;  %s46_s19 = int_to_ptr.vmem [resolvable:$true] %s45_s19  ;;  %s407_s22 = int_to_ptr.vmem [resolvable:$true] %s57_s22 }
  0x27   :  { %s231_s25 = scalar_lea.hbm %s487_s2, 256 }
  0x28   :  { %p232_p2 = scmp.ne.s32.totalorder %s487_s2, %s231_s25  ;;  %p235_p3 = scmp.lt.u32.totalorder %s231_s25, %s487_s2 }
  0x2a   :  { %p237_p4 = pnand %p235_p3, %p232_p2 }
  0x2c   :  { %240 = shalt.err (!%p237_p4)
}
  0x2d   :  { %s241_s0 = scalar_lea.vmem %s46_s19, 256  ;;  %p246_p6 = scmp.lt.s32.totalorder %s46_s19, %s46_s19 }
  0x2e   :  { %p242_p5 = scmp.ne.s32.totalorder %s46_s19, %s241_s0  ;;  %p247_p7 = scmp.lt.s32.totalorder %s241_s0, %s241_s0 }
  0x30   :  { %p248_p8 = por %p247_p7, %p246_p6 }
  0x32   :  { %p249_p9 = pnand %p248_p8, %p242_p5 }
  0x34   :  { %252 = shalt.err (!%p249_p9)
}
  0x35   :  { %51 = dma.hbm_to_vmem [thread:$0]  %s487_s2, 256, %s46_s19, [#allocation6], %s331_s30, %s331_s30, %s332_s6  }
  0x36   :  { %s253_s10 = scalar_lea.hbm %s488_s3, 256 }
  0x37   :  { %p254_p10 = scmp.ne.s32.totalorder %s488_s3, %s253_s10  ;;  %p257_p11 = scmp.lt.u32.totalorder %s253_s10, %s488_s3 }
  0x39   :  { %p259_p12 = pnand %p257_p11, %p254_p10 }
  0x3b   :  { %262 = shalt.err (!%p259_p12)
}
  0x3c   :  { %s263_s15 = scalar_lea.vmem %s407_s22, 256  ;;  %p268_p0 = scmp.lt.s32.totalorder %s407_s22, %s407_s22 }
  0x3d   :  { %p264_p13 = scmp.ne.s32.totalorder %s407_s22, %s263_s15  ;;  %p269_p1 = scmp.lt.s32.totalorder %s263_s15, %s263_s15 }
  0x3f   :  { %p270_p2 = por %p269_p1, %p268_p0 }
  0x41   :  { %p271_p3 = pnand %p270_p2, %p264_p13 }
  0x43   :  { %274 = shalt.err (!%p271_p3)
}
  0x44   :  { %63 = dma.hbm_to_vmem [thread:$0]  %s488_s3, 256, %s407_s22, [#allocation9], %s331_s30, %s331_s30, %s332_s6  }
  0x45   :  { %319 = dma.done.wait [#allocation3], 256  }
  0x46   :  { %320 = vsyncadd [#allocation3], 4294967040 }
  0x47   :  { %321 = dma.done.wait [#allocation6], 512  }
  0x48   :  { %322 = vsyncadd [#allocation6], 4294966784 }
  0x49   :  { %323 = dma.done.wait [#allocation9], 256  }
  0x4a   :  { %324 = vsyncadd [#allocation9], 4294967040  ;;  %v335_v0 = vmov 0   ;;  %v76_v1 = vld [vmem:[#allocation2] sm:$0xff]  ;;  %v77_v2 = vld [vmem:[#allocation2 + $0x8] sm:$0xff]  ;;  %v336_v5 = vmov 0.0  }
  0x4b   :  { %186 = vset.pattern.permute.xlu1 %v335_v0  ;;  %185 = vset.pattern.permute.xlu0 %v335_v0  ;;  %v84_v3 = vld [vmem:[#allocation5] sm:$0xff]  ;;  %vm78_vm0 = vcmp.lt.f32.partialorder %v76_v1, 0.5  ;;  %vm79_vm1 = vcmp.lt.f32.partialorder %v77_v2, 0.5  ;;  %v85_v4 = vld [vmem:[#allocation5 + $0x8] sm:$0xff]  ;;  %v337_v12 = vmov 1.0   ;;  %v102_v20 = vld [vmem:[#allocation7] sm:$0xff] }
  0x4c   :  { %vm86_vm2 = vcmp.lt.f32.partialorder %v84_v3, 0.5  ;;  %v170_v6 = vsel %vm78_vm0, 1.0, %v336_v5  ;;  %v171_v7 = vsel %vm79_vm1, 1.0, %v336_v5  ;;  %vm87_vm3 = vcmp.lt.f32.partialorder %v85_v4, 0.5  ;;  %v119_v19 = vld [vmem:[#allocation8] sm:$0xff]  ;;  %v120_v25 = vld [vmem:[#allocation8 + $0x8] sm:$0xff] }
  0x4d   :  { %v172_v8 = vsel %vm86_vm2, 1.0, %v336_v5  ;;  %v173_v9 = vsel %vm87_vm3, 1.0, %v336_v5  ;;  %vm116_vm6 = vcmask 261120   ;;  %v103_v26 = vld [vmem:[#allocation7 + $0x8] sm:$0xff]  ;;  %s338_s3 = smov [#allocation10]   ;;  %s339_s17 = smov [#allocation11]  }
  0x4e   :  { %v92_v10 = vadd.f32 %v172_v8, %v170_v6  ;;  %v93_v11 = vadd.f32 %v173_v9, %v171_v7  ;;  %s140_s1 = sshll.u32 %s338_s3, 4  ;;  %s152_s18 = sshll.u32 %s339_s17, 4  ;;  %s141_s1 = int_to_ptr.vmem [resolvable:$true] %s140_s1  ;;  %s446_s18 = int_to_ptr.vmem [resolvable:$true] %s152_s18 }
  0x4f   :  { %s275_s19 = scalar_lea.vmem %s141_s1, 256  ;;  %p280_p5 = scmp.lt.s32.totalorder %s141_s1, %s141_s1 }
  0x50   :  { %vm94_vm4 = vcmp.lt.f32.partialorder %v92_v10, 1.5  ;;  %vm95_vm5 = vcmp.lt.f32.partialorder %v93_v11, 1.5  ;;  %p276_p4 = scmp.ne.s32.totalorder %s141_s1, %s275_s19  ;;  %p281_p6 = scmp.lt.s32.totalorder %s275_s19, %s275_s19 }
  0x51   :  { %v96_v13 = vsel %vm94_vm4, 2.0, %v337_v12  ;;  %v97_v14 = vsel %vm95_vm5, 2.0, %v337_v12 }
  0x52   :  { %v100_v15 = vmul.f32 %v172_v8, %v96_v13  ;;  %v98_v16 = vmul.f32 %v170_v6, %v96_v13  ;;  %v101_v17 = vmul.f32 %v173_v9, %v97_v14  ;;  %v99_v18 = vmul.f32 %v171_v7, %v97_v14  ;;  %p282_p7 = por %p281_p6, %p280_p5 }
  0x54   :  { %123 = vperm.xlu1 %186, %v100_v15   ;;  %106 = vperm.xlu0 %185, %v98_v16   ;;  %p283_p8 = pnand %p282_p7, %p276_p4 }
  0x58   :  { %128 = vperm.xlu1 %186, %v101_v17   ;;  %111 = vperm.xlu0 %185, %v99_v18  }
  0xd3   :  { %v124_v21 = vpop.permute.xlu1 %123  ;;  %v107_v22 = vpop.permute.xlu0 %106 }
  0xd4   :  { %v131_v23 = vmul.f32 %v124_v21, %v119_v19  ;;  %v114_v24 = vmul.f32 %v107_v22, %v102_v20 }
  0xd6   :  { %117 = vst.msk [vmem:[#allocation10] sm:$0xff] %vm116_vm6, %v114_v24  ;;  %133 = vst.msk [vmem:[#allocation11] sm:$0xff] %vm116_vm6, %v131_v23 }
  0xd7   :  { %v129_v27 = vpop.permute.xlu1 %128  ;;  %v112_v28 = vpop.permute.xlu0 %111 }
  0xd8   :  { %v132_v29 = vmul.f32 %v129_v27, %v120_v25  ;;  %v115_v30 = vmul.f32 %v112_v28, %v103_v26 }
  0xda   :  { %118 = vst.msk [vmem:[#allocation10 + $0x8] sm:$0xff] %vm116_vm6, %v115_v30  ;;  %134 = vst.msk [vmem:[#allocation11 + $0x8] sm:$0xff] %vm116_vm6, %v132_v29 }
  0xdb   :  { %286 = shalt.err (!%p283_p8)
}
  0xdc   :  { %s287_s23 = scalar_lea.hbm %s489_s4, 256 }
  0xdd   :  { %p288_p9 = scmp.ne.s32.totalorder %s489_s4, %s287_s23  ;;  %p291_p10 = scmp.lt.u32.totalorder %s287_s23, %s489_s4 }
  0xdf   :  { %p293_p11 = pnand %p291_p10, %p288_p9 }
  0xe1   :  { %296 = shalt.err (!%p293_p11)
}
  0xe2   :  { %146 = dma.vmem_to_hbm [thread:$0]  %s141_s1, 256, %s489_s4, [#allocation4], %s331_s30, %s331_s30, %s332_s6  }
  0xe3   :  { %s297_s0 = scalar_lea.vmem %s446_s18, 256  ;;  %p302_p13 = scmp.lt.s32.totalorder %s446_s18, %s446_s18 }
  0xe4   :  { %p298_p12 = scmp.ne.s32.totalorder %s446_s18, %s297_s0  ;;  %p303_p0 = scmp.lt.s32.totalorder %s297_s0, %s297_s0 }
  0xe6   :  { %p304_p1 = por %p303_p0, %p302_p13 }
  0xe8   :  { %p305_p2 = pnand %p304_p1, %p298_p12 }
  0xea   :  { %308 = shalt.err (!%p305_p2)
}
  0xeb   :  { %s309_s8 = scalar_lea.hbm %s490_s5, 256 }
  0xec   :  { %p310_p3 = scmp.ne.s32.totalorder %s490_s5, %s309_s8  ;;  %p313_p4 = scmp.lt.u32.totalorder %s309_s8, %s490_s5 }
  0xee   :  { %p315_p5 = pnand %p313_p4, %p310_p3 }
  0xf0   :  { %318 = shalt.err (!%p315_p5)
}
  0xf1   :  { %158 = dma.vmem_to_hbm [thread:$0]  %s446_s18, 256, %s490_s5, [#allocation12], %s331_s30, %s331_s30, %s332_s6  }
  0xf2   :  { %325 = dma.done.wait [#allocation4], 256  }
  0xf3   :  { %326 = vsyncadd [#allocation4], 4294967040 }
  0xf4   :  { %327 = dma.done.wait [#allocation12], 256  }
  0xf5   :  { %328 = vsyncadd [#allocation12], 4294967040 }
  0xf6   :  { %165 = vsyncpa [#allocation3], 1 }
  0xf7   :  { %166 = vsyncpa [#allocation6], 1 }
  0xf8   :  { %167 = vsyncpa [#allocation9], 1 }
  0xf9   :  { %168 = vsyncpa [#allocation4], 1 }
  0xfa   :  { %169 = vsyncpa [#allocation12], 1 }

</bundles_post_ra>
